<compile_context>
chip_gen: v7x
topology: tpu7x:2x2x1
jax: 0.10.0
libtpu: 0.0.40
codegen_flags: <defaults>
</compile_context>

<pallas_src>
import jax
import jax.numpy as jnp
from jax.experimental import pallas as pl
from jax.experimental.pallas import tpu as pltpu

_LANES = 128
_SUBLANES = 8


def _dice_kernel(out_ref, tgt_ref, num_ref, den_ref):
    # out_ref / tgt_ref: (N, tile_s, 128) logits / targets for this grid step.
    # num_ref / den_ref: (N, 128) lane-dense accumulators (one block per
    # parallel chunk; revisited across the reduction axis).
    j = pl.program_id(1)

    @pl.when(j == 0)
    def _():
        num_ref[...] = jnp.zeros_like(num_ref)
        den_ref[...] = jnp.zeros_like(den_ref)

    o = jax.nn.sigmoid(out_ref[...].astype(jnp.float32))  # use_sigmoid=True
    t = tgt_ref[...].astype(jnp.float32)

    # Partial reduction over the sublane-tile axis only; keep 128 lanes dense.
    # sigmoid(x) >= 0, so abs() on `o` is unnecessary (numerically identical).
    num_ref[...] += jnp.sum(o * t, axis=1)
    den_ref[...] += jnp.sum(o + jnp.abs(t), axis=1)


def binary_dice_loss(output, target, *, reduction="mean", batch_dice=False,
                     target_step_bytes=2 << 20, num_chunks=2):
    """Dice loss. output/target: [N, *] (logits / targets), any float dtype."""
    assert output.shape[0] == target.shape[0], \
        "output & target batch size don't match"
    # TODO(synk): ignore_index masking not implemented (module default is None).

    n = 1 if batch_dice else output.shape[0]
    out2d = output.reshape(n, -1)
    tgt2d = target.reshape(n, -1)
    m = out2d.shape[1]

    isz = jnp.dtype(output.dtype).itemsize + jnp.dtype(target.dtype).itemsize

    # Sublane-tile size: ~target_step_bytes of input per grid step, multiple of 8.
    s_total = -(-m // _LANES)
    s_needed = -(-s_total // _SUBLANES) * _SUBLANES
    tile_s = (target_step_bytes // (n * _LANES * isz)) // _SUBLANES * _SUBLANES
    tile_s = max(_SUBLANES, tile_s)
    tile_s = min(tile_s, s_needed)

    # Parallel chunks of the reduction axis (megacore split on v7x).
    steps_if_single = -(-s_needed // tile_s)
    chunks = num_chunks if steps_if_single >= num_chunks else 1

    # Pad flattened length so it divides evenly into chunks * tile_s * 128.
    quantum = chunks * tile_s * _LANES
    m_pad = -(-m // quantum) * quantum
    pad = m_pad - m
    if pad:
        # Padded logits -> sigmoid == 0 exactly in f32; padded targets == 0:
        # padding contributes nothing to num / den.
        out2d = jnp.concatenate(
            [out2d, jnp.full((n, pad), -1e30, dtype=out2d.dtype)], axis=1)
        tgt2d = jnp.concatenate(
            [tgt2d, jnp.zeros((n, pad), dtype=tgt2d.dtype)], axis=1)

    s_pad = m_pad // _LANES
    out3d = out2d.reshape(n, s_pad, _LANES)
    tgt3d = tgt2d.reshape(n, s_pad, _LANES)

    steps = s_pad // (chunks * tile_s)
    grid = (chunks, steps)

    def in_map(c, j):
        return (0, c * steps + j, 0)

    def out_map(c, j):
        return (c, 0, 0)

    # Double-buffered input footprint + headroom; floor at 16 MiB, cap well
    # below v7x's 64 MiB physical VMEM.
    blk_bytes = n * tile_s * _LANES * isz
    vmem_limit = int(min(max(2 * blk_bytes + (4 << 20), 16 << 20), 40 << 20))

    num_p, den_p = pl.pallas_call(
        _dice_kernel,
        out_shape=(
            jax.ShapeDtypeStruct((chunks, n, _LANES), jnp.float32),
            jax.ShapeDtypeStruct((chunks, n, _LANES), jnp.float32),
        ),
        grid_spec=pltpu.PrefetchScalarGridSpec(
            num_scalar_prefetch=0,
            grid=grid,
            in_specs=[
                pl.BlockSpec((n, tile_s, _LANES), in_map),
                pl.BlockSpec((n, tile_s, _LANES), in_map),
            ],
            out_specs=(
                pl.BlockSpec((None, n, _LANES), out_map),
                pl.BlockSpec((None, n, _LANES), out_map),
            ),
        ),
        compiler_params=pltpu.CompilerParams(
            dimension_semantics=("parallel", "arbitrary"),
            vmem_limit_bytes=vmem_limit,
        ),
    )(out3d, tgt3d)

    # Tiny finalize in JAX: combine chunk/lane partials, apply smooth & loss.
    smooth = jnp.float32(1.0)
    num = 2.0 * jnp.sum(num_p, axis=(0, 2)) + smooth
    den = jnp.sum(den_p, axis=(0, 2)) + smooth
    loss = 1.0 - num / den

    if reduction == "mean":
        return jnp.mean(loss)
    elif reduction == "sum":
        return jnp.sum(loss)
    elif reduction == "none":
        return loss
    else:
        raise Exception("Unexpected reduction {}".format(reduction))


def _reference(output, target):
    # Pure-JAX reference mirroring the PyTorch forward (reduction='mean').
    n = output.shape[0]
    o = jax.nn.sigmoid(output.astype(jnp.float32)).reshape(n, -1)
    t = target.astype(jnp.float32).reshape(n, -1)
    num = 2.0 * jnp.sum(o * t, axis=1) + 1.0
    den = jnp.sum(jnp.abs(o) + jnp.abs(t), axis=1) + 1.0
    return jnp.mean(1.0 - num / den)


if __name__ == "__main__":
    key = jax.random.PRNGKey(0)

    # Case 1: spec-sized input [N, C, H, W] = [2, 4, 16, 16] (single-step grid).
    k1, k2 = jax.random.split(key)
    logits = jax.random.normal(k1, (2, 4, 16, 16), dtype=jnp.float32)
    target = (jax.random.uniform(k2, (2, 4, 16, 16)) > 0.5).astype(jnp.float32)
    loss = jax.block_until_ready(binary_dice_loss(logits, target))
    ref = jax.block_until_ready(_reference(logits, target))
    assert jnp.allclose(loss, ref, atol=1e-5, rtol=1e-5), (loss, ref)

    # Case 2: non-128-divisible flatten -> exercises padding path.
    k3, k4 = jax.random.split(k1)
    logits2 = jax.random.normal(k3, (2, 3, 40, 40), dtype=jnp.float32)
    target2 = (jax.random.uniform(k4, (2, 3, 40, 40)) > 0.5).astype(jnp.float32)
    loss2 = jax.block_until_ready(binary_dice_loss(logits2, target2))
    ref2 = jax.block_until_ready(_reference(logits2, target2))
    assert jnp.allclose(loss2, ref2, atol=1e-5, rtol=1e-5), (loss2, ref2)

    # Case 3: small per-step tile forced -> exercises multi-step reduction and
    # the 2-chunk parallel axis (accumulator + init-at-j==0 path).
    k5, k6 = jax.random.split(k3)
    logits3 = jax.random.normal(k5, (2, 4, 64, 64), dtype=jnp.float32)
    target3 = (jax.random.uniform(k6, (2, 4, 64, 64)) > 0.5).astype(jnp.float32)
    loss3 = jax.block_until_ready(
        binary_dice_loss(logits3, target3, target_step_bytes=1 << 15))
    ref3 = jax.block_until_ready(_reference(logits3, target3))
    assert jnp.allclose(loss3, ref3, atol=1e-5, rtol=1e-5), (loss3, ref3)

    print("KERNEL_OK")
</pallas_src>

<mosaic_0001>
module attributes {stable_mosaic.version = 11 : i64} {
  func.func @_dice_kernel(%arg0: i32, %arg1: i32, %arg2: memref<2x8x128xf32, #tpu.memory_space<vmem>>, %arg3: memref<2x8x128xf32, #tpu.memory_space<vmem>>, %arg4: memref<1x2x128xf32, #tpu.memory_space<vmem>>, %arg5: memref<1x2x128xf32, #tpu.memory_space<vmem>>) attributes {dimension_semantics = [#tpu.dimension_semantics<parallel>, #tpu.dimension_semantics<arbitrary>], iteration_bounds = array<i64: 1, 1>, scalar_prefetch = 0 : i64, scratch_operands = 0 : i64, tpu.core_type = #tpu.core_type<tc>, window_params = [{transform_indices = @transform_0, window_bounds = array<i64: 2, 8, 128>}, {transform_indices = @transform_1, window_bounds = array<i64: 2, 8, 128>}, {transform_indices = @transform_2, window_bounds = array<i64: 1, 2, 128>}, {transform_indices = @transform_3, window_bounds = array<i64: 1, 2, 128>}]} {
    %c0_i32 = arith.constant 0 : i32
    %0 = arith.cmpi eq, %arg1, %c0_i32 : i32
    %1 = arith.extui %0 : i1 to i32
    %c0_i32_0 = arith.constant 0 : i32
    %2 = arith.cmpi ne, %1, %c0_i32_0 : i32
    scf.if %2 {
      %cst_20 = arith.constant 0.000000e+00 : f32
      %27 = vector.broadcast %cst_20 : f32 to vector<2x128xf32>
      %c0_21 = arith.constant 0 : index
      %c0_22 = arith.constant 0 : index
      %c0_23 = arith.constant 0 : index
      %28 = vector.load %arg4[%c0_21, %c0_22, %c0_23] : memref<1x2x128xf32, #tpu.memory_space<vmem>>, vector<1x2x128xf32>
      %29 = vector.shape_cast %28 : vector<1x2x128xf32> to vector<2x128xf32>
      %30 = vector.shape_cast %27 : vector<2x128xf32> to vector<1x2x128xf32>
      tpu.vector_store %arg4[%c0_21, %c0_22, %c0_23], %30 {strides = array<i32>} : memref<1x2x128xf32, #tpu.memory_space<vmem>>, vector<1x2x128xf32>,
      %cst_24 = arith.constant 0.000000e+00 : f32
      %31 = vector.broadcast %cst_24 : f32 to vector<2x128xf32>
      %c0_25 = arith.constant 0 : index
      %c0_26 = arith.constant 0 : index
      %c0_27 = arith.constant 0 : index
      %32 = vector.load %arg5[%c0_25, %c0_26, %c0_27] : memref<1x2x128xf32, #tpu.memory_space<vmem>>, vector<1x2x128xf32>
      %33 = vector.shape_cast %32 : vector<1x2x128xf32> to vector<2x128xf32>
      %34 = vector.shape_cast %31 : vector<2x128xf32> to vector<1x2x128xf32>
      tpu.vector_store %arg5[%c0_25, %c0_26, %c0_27], %34 {strides = array<i32>} : memref<1x2x128xf32, #tpu.memory_space<vmem>>, vector<1x2x128xf32>,
    } else {
    }
    %c0 = arith.constant 0 : index
    %c0_1 = arith.constant 0 : index
    %c0_2 = arith.constant 0 : index
    %3 = vector.load %arg2[%c0, %c0_1, %c0_2] : memref<2x8x128xf32, #tpu.memory_space<vmem>>, vector<2x8x128xf32>
    %4 = arith.negf %3 : vector<2x8x128xf32>
    %5 = math.exp %4 : vector<2x8x128xf32>
    %cst = arith.constant 1.000000e+00 : f32
    %6 = vector.broadcast %cst : f32 to vector<2x8x128xf32>
    %7 = arith.addf %6, %5 : vector<2x8x128xf32>
    %8 = arith.divf %6, %7 : vector<2x8x128xf32>
    %c0_3 = arith.constant 0 : index
    %c0_4 = arith.constant 0 : index
    %c0_5 = arith.constant 0 : index
    %9 = vector.load %arg3[%c0_3, %c0_4, %c0_5] : memref<2x8x128xf32, #tpu.memory_space<vmem>>, vector<2x8x128xf32>
    %c0_6 = arith.constant 0 : index
    %c0_7 = arith.constant 0 : index
    %c0_8 = arith.constant 0 : index
    %10 = vector.load %arg4[%c0_6, %c0_7, %c0_8] : memref<1x2x128xf32, #tpu.memory_space<vmem>>, vector<1x2x128xf32>
    %11 = vector.shape_cast %10 : vector<1x2x128xf32> to vector<2x128xf32>
    %12 = arith.mulf %8, %9 : vector<2x8x128xf32>
    %cst_9 = arith.constant dense<0.000000e+00> : vector<2x128xf32>
    %13 = vector.multi_reduction <add>, %12, %cst_9 [1] : vector<2x8x128xf32> to vector<2x128xf32>
    %14 = arith.addf %11, %13 : vector<2x128xf32>
    %c0_10 = arith.constant 0 : index
    %c0_11 = arith.constant 0 : index
    %c0_12 = arith.constant 0 : index
    %15 = vector.load %arg4[%c0_10, %c0_11, %c0_12] : memref<1x2x128xf32, #tpu.memory_space<vmem>>, vector<1x2x128xf32>
    %16 = vector.shape_cast %15 : vector<1x2x128xf32> to vector<2x128xf32>
    %17 = vector.shape_cast %14 : vector<2x128xf32> to vector<1x2x128xf32>
    tpu.vector_store %arg4[%c0_10, %c0_11, %c0_12], %17 {strides = array<i32>} : memref<1x2x128xf32, #tpu.memory_space<vmem>>, vector<1x2x128xf32>,
    %c0_13 = arith.constant 0 : index
    %c0_14 = arith.constant 0 : index
    %c0_15 = arith.constant 0 : index
    %18 = vector.load %arg5[%c0_13, %c0_14, %c0_15] : memref<1x2x128xf32, #tpu.memory_space<vmem>>, vector<1x2x128xf32>
    %19 = vector.shape_cast %18 : vector<1x2x128xf32> to vector<2x128xf32>
    %20 = math.absf %9 : vector<2x8x128xf32>
    %21 = arith.addf %8, %20 : vector<2x8x128xf32>
    %cst_16 = arith.constant dense<0.000000e+00> : vector<2x128xf32>
    %22 = vector.multi_reduction <add>, %21, %cst_16 [1] : vector<2x8x128xf32> to vector<2x128xf32>
    %23 = arith.addf %19, %22 : vector<2x128xf32>
    %c0_17 = arith.constant 0 : index
    %c0_18 = arith.constant 0 : index
    %c0_19 = arith.constant 0 : index
    %24 = vector.load %arg5[%c0_17, %c0_18, %c0_19] : memref<1x2x128xf32, #tpu.memory_space<vmem>>, vector<1x2x128xf32>
    %25 = vector.shape_cast %24 : vector<1x2x128xf32> to vector<2x128xf32>
    %26 = vector.shape_cast %23 : vector<2x128xf32> to vector<1x2x128xf32>
    tpu.vector_store %arg5[%c0_17, %c0_18, %c0_19], %26 {strides = array<i32>} : memref<1x2x128xf32, #tpu.memory_space<vmem>>, vector<1x2x128xf32>,
    return
  }
  func.func @transform_0(%arg0: i32, %arg1: i32) -> (i32, i32, i32) {
    %c1_i32 = arith.constant 1 : i32
    %0 = arith.muli %arg0, %c1_i32 : i32
    %1 = arith.addi %0, %arg1 : i32
    %c0_i32 = arith.constant 0 : i32
    %c0_i32_0 = arith.constant 0 : i32
    %c0_i32_1 = arith.constant 0 : i32
    return %c0_i32, %1, %c0_i32_0 : i32, i32, i32
  }
  func.func @transform_1(%arg0: i32, %arg1: i32) -> (i32, i32, i32) {
    %c1_i32 = arith.constant 1 : i32
    %0 = arith.muli %arg0, %c1_i32 : i32
    %1 = arith.addi %0, %arg1 : i32
    %c0_i32 = arith.constant 0 : i32
    %c0_i32_0 = arith.constant 0 : i32
    %c0_i32_1 = arith.constant 0 : i32
    return %c0_i32, %1, %c0_i32_0 : i32, i32, i32
  }
  func.func @transform_2(%arg0: i32, %arg1: i32) -> (i32, i32, i32) {
    %c0_i32 = arith.constant 0 : i32
    %c0_i32_0 = arith.constant 0 : i32
    %c0_i32_1 = arith.constant 0 : i32
    return %arg0, %c0_i32, %c0_i32_0 : i32, i32, i32
  }
  func.func @transform_3(%arg0: i32, %arg1: i32) -> (i32, i32, i32) {
    %c0_i32 = arith.constant 0 : i32
    %c0_i32_0 = arith.constant 0 : i32
    %c0_i32_1 = arith.constant 0 : i32
    return %arg0, %c0_i32, %c0_i32_0 : i32, i32, i32
  }
}

</mosaic_0001>

<bundles_post_ra>
// kernel: tpu_custom_call.1
= control target key start
LH: loop header
LB: loop body
LE: loop exit
PB: predicated region body
PF: predicated region fallthrough
CT: control target
= control target key end

     0   :  { %9 = vsyncpa [#allocation3], 0  ;;  %s336_s0 = inlined_call_operand.hbm [shape: f32[2,8,128], index: 0, kind: input, shape index: {}]   ;;  %s337_s1 = inlined_call_operand.hbm [shape: f32[2,8,128], index: 1, kind: input, shape index: {}]   ;;  %s338_s2 = inlined_call_operand.hbm [shape: f32[1,2,128], index: 2, kind: output, shape index: {0}]   ;;  %s339_s3 = inlined_call_operand.hbm [shape: f32[1,2,128], index: 3, kind: output, shape index: {1}]  }
   0x1   :  { %10 = vsyncpa [#allocation6], 0 }
   0x2   :  { %11 = vsyncpa [#allocation4], 0 }
   0x3   :  { %12 = vsyncpa [#allocation9], 0  ;;  %s261_s12 = smov [#allocation2]   ;;  %s165_s16 = scalar_lea.hbm %s336_s0, 256 }
   0x4   :  { %s21_s13 = sshll.u32 %s261_s12, 4  ;;  %p166_p0 = scmp.ne.s32.totalorder %s336_s0, %s165_s16  ;;  %s22_s13 = int_to_ptr.vmem [resolvable:$true] %s21_s13 }
   0x5   :  { %p169_p1 = scmp.lt.u32.totalorder %s165_s16, %s336_s0 }
   0x7   :  { %p171_p2 = pnand %p169_p1, %p166_p0 }
   0x9   :  { %174 = shalt.err (!%p171_p2)
}
   0xa   :  { %s175_s21 = scalar_lea.vmem %s22_s13, 256  ;;  %p180_p4 = scmp.lt.s32.totalorder %s22_s13, %s22_s13 }
   0xb   :  { %p176_p3 = scmp.ne.s32.totalorder %s22_s13, %s175_s21  ;;  %p181_p5 = scmp.lt.s32.totalorder %s175_s21, %s175_s21 }
   0xd   :  { %p182_p6 = por %p181_p5, %p180_p4 }
   0xf   :  { %p183_p7 = pnand %p182_p6, %p176_p3 }
  0x11   :  { %186 = shalt.err (!%p183_p7)
}
  0x12   :  { %s262_s22 = smov 128   ;;  %s263_s23 = smov 8  }
  0x13   :  { %27 = dma.hbm_to_vmem [thread:$0]  %s336_s0, 256, %s22_s13, [#allocation3], %s262_s22, %s262_s22, %s263_s23  }
  0x14   :  { %s264_s26 = smov [#allocation5]   ;;  %s187_s30 = scalar_lea.hbm %s337_s1, 256 }
  0x15   :  { %s36_s27 = sshll.u32 %s264_s26, 4  ;;  %p188_p8 = scmp.ne.s32.totalorder %s337_s1, %s187_s30  ;;  %s37_s27 = int_to_ptr.vmem [resolvable:$true] %s36_s27 }
  0x16   :  { %p191_p9 = scmp.lt.u32.totalorder %s187_s30, %s337_s1 }
  0x18   :  { %p193_p10 = pnand %p191_p9, %p188_p8 }
  0x1a   :  { %196 = shalt.err (!%p193_p10)
}
  0x1b   :  { %s197_s8 = scalar_lea.vmem %s37_s27, 256  ;;  %p202_p12 = scmp.lt.s32.totalorder %s37_s27, %s37_s27 }
  0x1c   :  { %p198_p11 = scmp.ne.s32.totalorder %s37_s27, %s197_s8  ;;  %p203_p13 = scmp.lt.s32.totalorder %s197_s8, %s197_s8 }
  0x1e   :  { %p204_p0 = por %p203_p13, %p202_p12 }
  0x20   :  { %p205_p1 = pnand %p204_p0, %p198_p11 }
  0x22   :  { %208 = shalt.err (!%p205_p1)
}
  0x23   :  { %42 = dma.hbm_to_vmem [thread:$0]  %s337_s1, 256, %s37_s27, [#allocation6], %s262_s22, %s262_s22, %s263_s23  }
  0x24   :  { %253 = dma.done.wait [#allocation3], 256  }
  0x25   :  { %254 = vsyncadd [#allocation3], 4294967040 }
  0x26   :  { %255 = dma.done.wait [#allocation6], 256  }
  0x27   :  { %256 = vsyncadd [#allocation6], 4294967040  ;;  %v265_v0 = vmov 0.0   ;;  %v57_v1 = vld [vmem:[#allocation2] sm:$0xff]  ;;  %v58_v2 = vld [vmem:[#allocation2 + $0x8] sm:$0xff]  ;;  %vm90_vm0 = vcmask 1041409  }
  0x28   :  { %55 = vst [vmem:[#allocation7] sm:$0x3] %v265_v0  ;;  %56 = vst [vmem:[#allocation8] sm:$0x3] %v265_v0  ;;  %v148_v3 = vmul.f32 -1.442695, %v57_v1 }
  0x29   :  { %v149_v4 = vmul.f32 -1.442695, %v58_v2  ;;  %v71_v9 = vld [vmem:[#allocation5] sm:$0xff]  ;;  %v72_v10 = vld [vmem:[#allocation5 + $0x8] sm:$0xff]  ;;  %s266_s1 = smov [#allocation7]   ;;  %s267_s11 = smov [#allocation8]  }
  0x2a   :  { %157 = vpow2.f32 %v148_v3  ;;  %v96_v11 = vand.u32 2147483647, %v71_v9  ;;  %v97_v12 = vand.u32 2147483647, %v72_v10  ;;  %s124_s10 = sshll.u32 %s266_s1, 4  ;;  %s134_s12 = sshll.u32 %s267_s11, 4  ;;  %s125_s10 = int_to_ptr.vmem [resolvable:$true] %s124_s10  ;;  %s135_s12 = int_to_ptr.vmem [resolvable:$true] %s134_s12 }
  0x2b   :  { %159 = vpow2.f32 %v149_v4  ;;  %s209_s13 = scalar_lea.vmem %s125_s10, 32  ;;  %p214_p3 = scmp.lt.s32.totalorder %s125_s10, %s125_s10 }
  0x2c   :  { %p210_p2 = scmp.ne.s32.totalorder %s125_s10, %s209_s13  ;;  %p215_p4 = scmp.lt.s32.totalorder %s209_s13, %s209_s13 }
  0x2e   :  { %p216_p5 = por %p215_p4, %p214_p3 }
  0x2f   :  { %v73_v41 = vld [vmem:[#allocation7] sm:$0x3]  ;;  %v95_v43 = vld [vmem:[#allocation8] sm:$0x3] }
  0x30   :  { %p217_p6 = pnand %p216_p5, %p210_p2 }
  0x34   :  { %v158_v5 = vpop.eup %157 }
  0x35   :  { %v160_v6 = vpop.eup %159  ;;  %v65_v7 = vadd.f32 1.0, %v158_v5 }
  0x36   :  { %v66_v8 = vadd.f32 1.0, %v160_v6 }
  0x37   :  { %161 = vrcp.f32 %v65_v7 }
  0x38   :  { %163 = vrcp.f32 %v66_v8 }
  0x41   :  { %v162_v13 = vpop.eup %161 }
  0x42   :  { %v164_v14 = vpop.eup %163  ;;  %v74_v15 = vmul.f32 %v162_v13, %v71_v9  ;;  %v98_v16 = vadd.f32 %v162_v13, %v96_v11 }
  0x43   :  { %v75_v17 = vmul.f32 %v164_v14, %v72_v10  ;;  %v99_v18 = vadd.f32 %v164_v14, %v97_v12 }
  0x44   :  { %v76_v19 = vrot.slane %v74_v15, 4  ;;  %v100_v20 = vrot.slane %v98_v16, 4 }
  0x45   :  { %v82_v21 = vrot.slane %v75_v17, 4  ;;  %v106_v22 = vrot.slane %v99_v18, 4 }
  0x46   :  { %v77_v23 = vadd.f32 %v76_v19, %v74_v15  ;;  %v101_v24 = vadd.f32 %v100_v20, %v98_v16 }
  0x47   :  { %v83_v25 = vadd.f32 %v82_v21, %v75_v17  ;;  %v107_v26 = vadd.f32 %v106_v22, %v99_v18 }
  0x48   :  { %v78_v27 = vrot.slane %v77_v23, 2  ;;  %v102_v28 = vrot.slane %v101_v24, 2 }
  0x49   :  { %v84_v29 = vrot.slane %v83_v25, 2  ;;  %v108_v30 = vrot.slane %v107_v26, 2 }
  0x4a   :  { %v79_v31 = vadd.f32 %v78_v27, %v77_v23  ;;  %v103_v32 = vadd.f32 %v102_v28, %v101_v24 }
  0x4b   :  { %v85_v33 = vadd.f32 %v84_v29, %v83_v25  ;;  %v109_v34 = vadd.f32 %v108_v30, %v107_v26 }
  0x4c   :  { %v80_v35 = vrot.slane %v79_v31, 1  ;;  %v104_v36 = vrot.slane %v103_v32, 1 }
  0x4d   :  { %v86_v37 = vrot.slane %v85_v33, 1  ;;  %v110_v38 = vrot.slane %v109_v34, 1 }
  0x4e   :  { %v81_v39 = vadd.f32 %v80_v35, %v79_v31  ;;  %v105_v40 = vadd.f32 %v104_v36, %v103_v32 }
  0x4f   :  { %v87_v42 = vadd.f32 %v86_v37, %v85_v33  ;;  %v111_v44 = vadd.f32 %v110_v38, %v109_v34 }
  0x51   :  { %v91_v45 = vsel %vm90_vm0, %v87_v42, %v81_v39  ;;  %v114_v46 = vsel %vm90_vm0, %v111_v44, %v105_v40 }
  0x52   :  { %v93_v47 = vadd.f32 %v91_v45, %v73_v41  ;;  %v116_v48 = vadd.f32 %v114_v46, %v95_v43 }
  0x54   :  { %94 = vst [vmem:[#allocation7] sm:$0x3] %v93_v47  ;;  %117 = vst [vmem:[#allocation8] sm:$0x3] %v116_v48 }
  0x55   :  { %220 = shalt.err (!%p217_p6)
}
  0x56   :  { %s221_s16 = scalar_lea.hbm %s338_s2, 32 }
  0x57   :  { %p222_p7 = scmp.ne.s32.totalorder %s338_s2, %s221_s16  ;;  %p225_p8 = scmp.lt.u32.totalorder %s221_s16, %s338_s2 }
  0x59   :  { %p227_p9 = pnand %p225_p8, %p222_p7 }
  0x5b   :  { %230 = shalt.err (!%p227_p9)
}
  0x5c   :  { %127 = dma.vmem_to_hbm [thread:$0]  %s125_s10, 32, %s338_s2, [#allocation4]  }
  0x5d   :  { %s231_s23 = scalar_lea.vmem %s135_s12, 32  ;;  %p236_p11 = scmp.lt.s32.totalorder %s135_s12, %s135_s12 }
  0x5e   :  { %p232_p10 = scmp.ne.s32.totalorder %s135_s12, %s231_s23  ;;  %p237_p12 = scmp.lt.s32.totalorder %s231_s23, %s231_s23 }
  0x60   :  { %p238_p13 = por %p237_p12, %p236_p11 }
  0x62   :  { %p239_p0 = pnand %p238_p13, %p232_p10 }
  0x64   :  { %242 = shalt.err (!%p239_p0)
}
  0x65   :  { %s243_s26 = scalar_lea.hbm %s339_s3, 32 }
  0x66   :  { %p244_p1 = scmp.ne.s32.totalorder %s339_s3, %s243_s26  ;;  %p247_p2 = scmp.lt.u32.totalorder %s243_s26, %s339_s3 }
  0x68   :  { %p249_p3 = pnand %p247_p2, %p244_p1 }
  0x6a   :  { %252 = shalt.err (!%p249_p3)
}
  0x6b   :  { %137 = dma.vmem_to_hbm [thread:$0]  %s135_s12, 32, %s339_s3, [#allocation9]  }
  0x6c   :  { %257 = dma.done.wait [#allocation4], 32  }
  0x6d   :  { %258 = vsyncadd [#allocation4], 4294967264 }
  0x6e   :  { %259 = dma.done.wait [#allocation9], 32  }
  0x6f   :  { %260 = vsyncadd [#allocation9], 4294967264 }
  0x70   :  { %144 = vsyncpa [#allocation3], 1 }
  0x71   :  { %145 = vsyncpa [#allocation6], 1 }
  0x72   :  { %146 = vsyncpa [#allocation4], 1 }
  0x73   :  { %147 = vsyncpa [#allocation9], 1 }

</bundles_post_ra>
